<compile_context>
chip_gen: v7x
topology: tpu7x:2x2x1
jax: 0.10.0
libtpu: 0.0.40
codegen_flags: <defaults>
</compile_context>

<pallas_src>
import jax
import jax.numpy as jnp
from jax.experimental import pallas as pl
from jax.experimental.pallas import tpu as pltpu

IN_CHANNELS = 1024   # FastRCNN box head representation size (module uses 1024)
NUM_CLASSES = 8      # small few-shot class count
COSINE_SCALE = 20.0
EPS = 1e-5
_SPLIT_THRESHOLD = 512   # min N for which we force >=2 RoI tiles (v7x megacore)


def _round_up(a, b):
    return (a + b - 1) // b * b


def _fused_predictor_kernel(x_ref, w_ref, b_ref, m_ref, out_ref):
    """y = x @ W_fused  (single bf16 MXU matmul, f32 accumulation), then
         out = y * (1 + mask*(1/(||x||+eps) - 1)) + bias   (cast to bf16).
       x_ref:[TN,C] f32, w_ref:[C,P] bf16, b_ref:[1,P] f32 (bias, zero on class
       cols), m_ref:[1,P] f32 (1.0 on class cols, else 0.0), out_ref:[TN,P] bf16.
    """
    x = x_ref[...]                                                    # [TN, C] f32
    y = jnp.dot(x.astype(jnp.bfloat16), w_ref[...],
                preferred_element_type=jnp.float32)                   # [TN, P] f32

    # Per-row inverse L2 norm of the features (f32 math, EUP reciprocal).
    sumsq = jnp.sum(x * x, axis=1, keepdims=True)                     # [TN, 1]
    inv_norm = pl.reciprocal(jnp.sqrt(sumsq) + EPS, approx=True)      # [TN, 1]

    # Class columns get the cosine row-scale, bbox columns pass through; the
    # cosine_scale is already folded into the weights, bias is zero on class
    # columns.  row_scale = 1 + m*(inv_norm - 1).
    row_scale = 1.0 + m_ref[...] * (inv_norm - 1.0)                   # [TN, P]
    out_ref[...] = (y * row_scale + b_ref[...]).astype(out_ref.dtype)


def cosine_predictor(x, w_cls, w_bbox, b_bbox, cosine_scale, *, tile_n=1024):
    """JAX wrapper mirroring CosineSimilarityFastRCNNPredictor.forward."""
    if x.ndim > 2:                       # torch.flatten(x, start_dim=1)
        x = x.reshape(x.shape[0], -1)
    x = x.astype(jnp.float32)            # no-op for the f32 box-head features
    n, c = x.shape
    k = w_cls.shape[0]
    out_feats = 5 * k                    # K class scores + 4K bbox deltas
    out_pad = _round_up(max(out_feats, 128), 128)   # lane-dense output width

    # ---- static weight prep (off the kernel critical path) ----------------
    w_cls = w_cls.astype(jnp.float32)
    wc_norm = w_cls / (jnp.sqrt(jnp.sum(w_cls * w_cls, axis=1, keepdims=True)) + EPS)
    scale = cosine_scale.reshape(()).astype(jnp.float32)
    w_fused = jnp.concatenate([scale * wc_norm, w_bbox.astype(jnp.float32)],
                              axis=0)                                 # [5K, C]
    w_fused = jnp.pad(w_fused.T, ((0, 0), (0, out_pad - out_feats)))  # [C, P]
    bias = jnp.pad(b_bbox.astype(jnp.float32),
                   (k, out_pad - out_feats)).reshape(1, out_pad)      # [1, P]
    cls_mask = (jnp.arange(out_pad) < k).astype(jnp.float32).reshape(1, out_pad)

    # ---- RoI tiling --------------------------------------------------------
    # Big tiles (<= tile_n) to amortize per-step overhead on v5e/v6e, but cap
    # at ceil(N/2) once N >= _SPLIT_THRESHOLD so v7x gets >= 2 parallel tiles
    # (one per TensorCore).  Tiny inputs stay single-tile.
    n8 = _round_up(n, 8)
    if n8 < _SPLIT_THRESHOLD:
        tn = n8
    else:
        half = _round_up(pl.cdiv(n8, 2), 8)
        tn = min(tile_n, half)
    n_pad = _round_up(n, tn)
    x_p = x
    if n_pad != n:                       # only pad the ragged last tile (rare)
        x_p = jnp.pad(x_p, ((0, n_pad - n), (0, 0)))

    cost = pl.CostEstimate(
        flops=2 * n_pad * c * out_pad,
        transcendentals=n_pad,
        bytes_accessed=n_pad * c * 4 + c * out_pad * 2 + n_pad * out_pad * 2,
    )

    out = pl.pallas_call(
        _fused_predictor_kernel,
        out_shape=jax.ShapeDtypeStruct((n_pad, out_pad), jnp.bfloat16),
        grid=(n_pad // tn,),
        in_specs=[
            pl.BlockSpec((tn, c), lambda i: (i, 0)),        # x tiles (f32 stream)
            pl.BlockSpec((c, out_pad), lambda i: (0, 0)),   # fused weight (resident)
            pl.BlockSpec((1, out_pad), lambda i: (0, 0)),   # padded bias (resident)
            pl.BlockSpec((1, out_pad), lambda i: (0, 0)),   # class-column mask
        ],
        out_specs=pl.BlockSpec((tn, out_pad), lambda i: (i, 0)),
        compiler_params=pltpu.CompilerParams(
            dimension_semantics=("parallel",)),
        cost_estimate=cost,
    )(x_p, w_fused.astype(jnp.bfloat16), bias, cls_mask)

    # Module API returns f32; only 5K of the 128 lanes are meaningful so this
    # slice+cast is negligible traffic.
    scores = out[:n, :k].astype(jnp.float32)
    deltas = out[:n, k:out_feats].astype(jnp.float32)
    return scores, deltas


def _reference(x, w_cls, w_bbox, b_bbox, cosine_scale):
    if x.ndim > 2:
        x = x.reshape(x.shape[0], -1)
    x_norm = x / (jnp.linalg.norm(x, axis=1, keepdims=True) + EPS)
    wc_norm = w_cls / (jnp.linalg.norm(w_cls, axis=1, keepdims=True) + EPS)
    scores = cosine_scale[0] * (x_norm @ wc_norm.T)
    deltas = x @ w_bbox.T + b_bbox
    return scores, deltas


if __name__ == "__main__":
    key = jax.random.PRNGKey(0)
    k_x, k_wc, k_wb = jax.random.split(key, 3)

    n_rois = 16
    # RoI box-head features (output of TwoMLPHead): [N, 1024]
    x = jax.random.normal(k_x, (n_rois, IN_CHANNELS), dtype=jnp.float32)

    # deterministic parameter init matching __init__:
    #   cls_score.weight ~ N(0, 0.01), no bias
    #   bbox_pred.weight ~ N(0, 0.001), bias = 0
    #   cosine_scale = 20
    w_cls = 0.01 * jax.random.normal(k_wc, (NUM_CLASSES, IN_CHANNELS), dtype=jnp.float32)
    w_bbox = 0.001 * jax.random.normal(k_wb, (NUM_CLASSES * 4, IN_CHANNELS), dtype=jnp.float32)
    b_bbox = jnp.zeros((NUM_CLASSES * 4,), dtype=jnp.float32)
    cosine_scale = jnp.array([COSINE_SCALE], dtype=jnp.float32)

    scores, deltas = cosine_predictor(x, w_cls, w_bbox, b_bbox, cosine_scale)
    scores = jax.block_until_ready(scores)
    deltas = jax.block_until_ready(deltas)

    ref_scores, ref_deltas = _reference(x, w_cls, w_bbox, b_bbox, cosine_scale)
    assert scores.shape == (n_rois, NUM_CLASSES)
    assert deltas.shape == (n_rois, NUM_CLASSES * 4)
    # bf16 matmul inputs + bf16 output store + approx reciprocal => relaxed tol
    assert jnp.allclose(scores, ref_scores, atol=2e-2, rtol=2e-2)
    assert jnp.allclose(deltas, ref_deltas, atol=2e-2, rtol=2e-2)

    print("KERNEL_OK")
</pallas_src>

<mosaic_0001>
module attributes {stable_mosaic.version = 11 : i64} {
  func.func @_fused_predictor_kernel(%arg0: i32, %arg1: memref<16x1024xf32, #tpu.memory_space<vmem>>, %arg2: memref<1024x128xbf16, #tpu.memory_space<vmem>>, %arg3: memref<1x128xf32, #tpu.memory_space<vmem>>, %arg4: memref<1x128xf32, #tpu.memory_space<vmem>>, %arg5: memref<16x128xbf16, #tpu.memory_space<vmem>>) attributes {dimension_semantics = [#tpu.dimension_semantics<parallel>], iteration_bounds = array<i64: 1>, scalar_prefetch = 0 : i64, scratch_operands = 0 : i64, tpu.core_type = #tpu.core_type<tc>, window_params = [{transform_indices = @transform_0, window_bounds = array<i64: 16, 1024>}, {pipeline_mode = #tpu.pipeline_mode<synchronous>, transform_indices = @transform_1, window_bounds = array<i64: 1024, 128>}, {pipeline_mode = #tpu.pipeline_mode<synchronous>, transform_indices = @transform_2, window_bounds = array<i64: 1, 128>}, {pipeline_mode = #tpu.pipeline_mode<synchronous>, transform_indices = @transform_3, window_bounds = array<i64: 1, 128>}, {transform_indices = @transform_4, window_bounds = array<i64: 16, 128>}]} {
    %c0 = arith.constant 0 : index
    %c0_0 = arith.constant 0 : index
    %0 = vector.load %arg1[%c0, %c0_0] : memref<16x1024xf32, #tpu.memory_space<vmem>>, vector<16x1024xf32>
    %1 = arith.truncf %0 : vector<16x1024xf32> to vector<16x1024xbf16>
    %c0_1 = arith.constant 0 : index
    %c0_2 = arith.constant 0 : index
    %2 = vector.load %arg2[%c0_1, %c0_2] : memref<1024x128xbf16, #tpu.memory_space<vmem>>, vector<1024x128xbf16>
    %cst = arith.constant dense<0.000000e+00> : vector<16x128xf32>
    %3 = tpu.matmul %1, %2, %cst {dimension_numbers = #tpu.dot_dimension_numbers<[1], [0], [0], [1], [0, 0, 1, 1], [], []>} : vector<16x1024xbf16>, vector<1024x128xbf16>, vector<16x128xf32> -> vector<16x128xf32>
    %4 = arith.mulf %0, %0 : vector<16x1024xf32>
    %cst_3 = arith.constant dense<0.000000e+00> : vector<16xf32>
    %5 = vector.multi_reduction <add>, %4, %cst_3 [1] : vector<16x1024xf32> to vector<16xf32>
    %6 = vector.shape_cast %5 : vector<16xf32> to vector<16x1xf32>
    %7 = math.sqrt %6 : vector<16x1xf32>
    %cst_4 = arith.constant 9.99999974E-6 : f32
    %8 = vector.broadcast %cst_4 : f32 to vector<16x1xf32>
    %9 = arith.addf %7, %8 : vector<16x1xf32>
    %10 = tpu.reciprocal %9 {approx = true} : vector<16x1xf32> -> vector<16x1xf32>
    %c0_5 = arith.constant 0 : index
    %c0_6 = arith.constant 0 : index
    %11 = vector.load %arg4[%c0_5, %c0_6] : memref<1x128xf32, #tpu.memory_space<vmem>>, vector<1x128xf32>
    %cst_7 = arith.constant 1.000000e+00 : f32
    %12 = vector.broadcast %cst_7 : f32 to vector<16x1xf32>
    %13 = arith.subf %10, %12 : vector<16x1xf32>
    %14 = vector.broadcast %11 : vector<1x128xf32> to vector<16x128xf32>
    %15 = vector.broadcast %13 : vector<16x1xf32> to vector<16x128xf32>
    %16 = arith.mulf %14, %15 : vector<16x128xf32>
    %cst_8 = arith.constant 1.000000e+00 : f32
    %17 = vector.broadcast %cst_8 : f32 to vector<16x128xf32>
    %18 = arith.addf %17, %16 : vector<16x128xf32>
    %19 = arith.mulf %3, %18 : vector<16x128xf32>
    %c0_9 = arith.constant 0 : index
    %c0_10 = arith.constant 0 : index
    %20 = vector.load %arg3[%c0_9, %c0_10] : memref<1x128xf32, #tpu.memory_space<vmem>>, vector<1x128xf32>
    %21 = vector.broadcast %20 : vector<1x128xf32> to vector<16x128xf32>
    %22 = arith.addf %19, %21 : vector<16x128xf32>
    %23 = arith.truncf %22 : vector<16x128xf32> to vector<16x128xbf16>
    %c0_11 = arith.constant 0 : index
    %c0_12 = arith.constant 0 : index
    %24 = vector.load %arg5[%c0_11, %c0_12] : memref<16x128xbf16, #tpu.memory_space<vmem>>, vector<16x128xbf16>
    tpu.vector_store %arg5[%c0_11, %c0_12], %23 {strides = array<i32>} : memref<16x128xbf16, #tpu.memory_space<vmem>>, vector<16x128xbf16>,
    return
  }
  func.func @transform_0(%arg0: i32) -> (i32, i32) {
    %c0_i32 = arith.constant 0 : i32
    %c0_i32_0 = arith.constant 0 : i32
    return %arg0, %c0_i32 : i32, i32
  }
  func.func @transform_1(%arg0: i32) -> (i32, i32) {
    %c0_i32 = arith.constant 0 : i32
    %c0_i32_0 = arith.constant 0 : i32
    %c0_i32_1 = arith.constant 0 : i32
    return %c0_i32, %c0_i32_0 : i32, i32
  }
  func.func @transform_2(%arg0: i32) -> (i32, i32) {
    %c0_i32 = arith.constant 0 : i32
    %c0_i32_0 = arith.constant 0 : i32
    %c0_i32_1 = arith.constant 0 : i32
    return %c0_i32, %c0_i32_0 : i32, i32
  }
  func.func @transform_3(%arg0: i32) -> (i32, i32) {
    %c0_i32 = arith.constant 0 : i32
    %c0_i32_0 = arith.constant 0 : i32
    %c0_i32_1 = arith.constant 0 : i32
    return %c0_i32, %c0_i32_0 : i32, i32
  }
  func.func @transform_4(%arg0: i32) -> (i32, i32) {
    %c0_i32 = arith.constant 0 : i32
    %c0_i32_0 = arith.constant 0 : i32
    return %arg0, %c0_i32 : i32, i32
  }
}

</mosaic_0001>

<bundles_post_ra>
// kernel: tpu_custom_call.1
= control target key start
LH: loop header
LB: loop body
LE: loop exit
PB: predicated region body
PF: predicated region fallthrough
CT: control target
= control target key end

     0   :  { %9 = vsyncpa [#allocation3], 0  ;;  %s1256_s0 = inlined_call_operand.hbm [shape: f32[16,1024], index: 0, kind: input, shape index: {}]   ;;  %s1257_s1 = inlined_call_operand.hbm [shape: bf16[1024,128], index: 1, kind: input, shape index: {}]   ;;  %s1258_s2 = inlined_call_operand.vmem [shape: f32[1,128], index: 2, kind: input, shape index: {}]   ;;  %s1259_s3 = inlined_call_operand.vmem [shape: f32[1,128], index: 3, kind: input, shape index: {}]   ;;  %s1260_s4 = inlined_call_operand.hbm [shape: bf16[16,128], index: 4, kind: output, shape index: {}]  }
   0x1   :  { %10 = vsyncpa [#allocation6], 0 }
   0x2   :  { %11 = vsyncpa [#allocation4], 0  ;;  %s1166_s15 = smov [#allocation2]   ;;  %s1094_s19 = scalar_lea.hbm %s1256_s0, 2048 }
   0x3   :  { %s17_s16 = sshll.u32 %s1166_s15, 4  ;;  %p1095_p0 = scmp.ne.s32.totalorder %s1256_s0, %s1094_s19  ;;  %s18_s16 = int_to_ptr.vmem [resolvable:$true] %s17_s16 }
   0x4   :  { %p1098_p1 = scmp.lt.u32.totalorder %s1094_s19, %s1256_s0 }
   0x6   :  { %p1100_p2 = pnand %p1098_p1, %p1095_p0 }
   0x8   :  { %1103 = shalt.err (!%p1100_p2)
}
   0x9   :  { %s1104_s24 = scalar_lea.vmem %s18_s16, 2048  ;;  %p1109_p4 = scmp.lt.s32.totalorder %s18_s16, %s18_s16 }
   0xa   :  { %p1105_p3 = scmp.ne.s32.totalorder %s18_s16, %s1104_s24  ;;  %p1110_p5 = scmp.lt.s32.totalorder %s1104_s24, %s1104_s24 }
   0xc   :  { %p1111_p6 = por %p1110_p5, %p1109_p4 }
   0xe   :  { %p1112_p7 = pnand %p1111_p6, %p1105_p3 }
  0x10   :  { %1115 = shalt.err (!%p1112_p7)
}
  0x11   :  { %s1167_s25 = smov 1024   ;;  %s1168_s26 = smov 64  }
  0x12   :  { %23 = dma.hbm_to_vmem [thread:$0]  %s1256_s0, 2048, %s18_s16, [#allocation3], %s1167_s25, %s1167_s25, %s1168_s26  }
  0x13   :  { %s1169_s29 = smov [#allocation5]   ;;  %s1116_s7 = scalar_lea.hbm %s1257_s1, 8192 }
  0x14   :  { %s29_s30 = sshll.u32 %s1169_s29, 4  ;;  %p1117_p8 = scmp.ne.s32.totalorder %s1257_s1, %s1116_s7  ;;  %s30_s30 = int_to_ptr.vmem [resolvable:$true] %s29_s30 }
  0x15   :  { %p1120_p9 = scmp.lt.u32.totalorder %s1116_s7, %s1257_s1 }
  0x17   :  { %p1122_p10 = pnand %p1120_p9, %p1117_p8 }
  0x19   :  { %1125 = shalt.err (!%p1122_p10)
}
  0x1a   :  { %s1126_s12 = scalar_lea.vmem %s30_s30, 8192  ;;  %p1131_p12 = scmp.lt.s32.totalorder %s30_s30, %s30_s30 }
  0x1b   :  { %p1127_p11 = scmp.ne.s32.totalorder %s30_s30, %s1126_s12  ;;  %p1132_p13 = scmp.lt.s32.totalorder %s1126_s12, %s1126_s12 }
  0x1d   :  { %p1133_p0 = por %p1132_p13, %p1131_p12 }
  0x1f   :  { %p1134_p1 = pnand %p1133_p0, %p1127_p11 }
  0x21   :  { %1137 = shalt.err (!%p1134_p1)
}
  0x22   :  { %s1170_s0 = smov 4  }
  0x23   :  { %35 = dma.hbm_to_vmem [thread:$0]  %s1257_s1, 8192, %s30_s30, [#allocation6], %s1168_s26, %s1168_s26, %s1170_s0  }
  0x24   :  { %1160 = dma.done.wait [#allocation3], 2048  }
  0x25   :  { %1161 = vsyncadd [#allocation3], 4294965248 }
  0x26   :  { %1162 = dma.done.wait [#allocation6], 8192  }
  0x27   :  { %1163 = vsyncadd [#allocation6], 4294959104  ;;  %v1022_v0 = vld [vmem:[#allocation5 + $0x40] sm:$0xff]   ;;  %v1026_v4 = vld [vmem:[#allocation5 + $0x48] sm:$0xff]   ;;  %s1171_s17 = smov [#allocation7]  }
  0x28   :  { %v1023_v1 = vld [vmem:[#allocation5 + $0xc0] sm:$0xff]   ;;  %928 = vmatprep.subr.bf16.mxu0 %v1022_v0  ;;  %v1027_v5 = vld [vmem:[#allocation5 + $0xc8] sm:$0xff]   ;;  %v1030_v8 = vld [vmem:[#allocation5 + $0x50] sm:$0xff]   ;;  %s838_s18 = sshll.u32 %s1171_s17, 4  ;;  %s839_s18 = int_to_ptr.vmem [resolvable:$true] %s838_s18 }
  0x29   :  { %v1024_v2 = vld [vmem:[#allocation5] sm:$0xff]   ;;  %950 = vmatprep.subr.bf16.mxu1 %v1023_v1  ;;  %v1028_v6 = vld [vmem:[#allocation5 + $0x8] sm:$0xff]   ;;  %v1031_v9 = vld [vmem:[#allocation5 + $0xd0] sm:$0xff]   ;;  %s1138_s19 = scalar_lea.vmem %s839_s18, 128  ;;  %p1143_p3 = scmp.lt.s32.totalorder %s839_s18, %s839_s18 }
  0x2a   :  { %v1025_v3 = vld [vmem:[#allocation5 + $0x80] sm:$0xff]   ;;  %929 = vmatpush3.bf16.msra.mxu0 %v1024_v2  ;;  %v1029_v7 = vld [vmem:[#allocation5 + $0x88] sm:$0xff]   ;;  %v1032_v10 = vld [vmem:[#allocation5 + $0x10] sm:$0xff]   ;;  %p1139_p2 = scmp.ne.s32.totalorder %s839_s18, %s1138_s19  ;;  %p1144_p4 = scmp.lt.s32.totalorder %s1138_s19, %s1138_s19 }
  0x2b   :  { %951 = vmatpush3.bf16.msra.mxu1 %v1025_v3  ;;  %930 = vmatprep.subr.bf16.mxu0 %v1026_v4  ;;  %v1033_v11 = vld [vmem:[#allocation5 + $0x90] sm:$0xff]   ;;  %v1034_v12 = vld [vmem:[#allocation5 + $0x58] sm:$0xff]   ;;  %v1038_v16 = vld [vmem:[#allocation5 + $0x60] sm:$0xff]  }
  0x2c   :  { %952 = vmatprep.subr.bf16.mxu1 %v1027_v5  ;;  %v1035_v13 = vld [vmem:[#allocation5 + $0xd8] sm:$0xff]   ;;  %v1039_v17 = vld [vmem:[#allocation5 + $0xe0] sm:$0xff]   ;;  %v1042_v20 = vld [vmem:[#allocation5 + $0x68] sm:$0xff]   ;;  %p1145_p5 = por %p1144_p4, %p1143_p3 }
  0x2d   :  { %v1036_v14 = vld [vmem:[#allocation5 + $0x18] sm:$0xff]   ;;  %v1040_v18 = vld [vmem:[#allocation5 + $0x20] sm:$0xff]   ;;  %v1043_v21 = vld [vmem:[#allocation5 + $0xe8] sm:$0xff]  }
  0x2e   :  { %931 = vmatpush3.bf16.msra.mxu0 %v1028_v6  ;;  %v1037_v15 = vld [vmem:[#allocation5 + $0x98] sm:$0xff]   ;;  %v1041_v19 = vld [vmem:[#allocation5 + $0xa0] sm:$0xff]   ;;  %v1044_v22 = vld [vmem:[#allocation5 + $0x28] sm:$0xff]   ;;  %p1146_p6 = pnand %p1145_p5, %p1139_p2 }
  0x2f   :  { %953 = vmatpush3.bf16.msra.mxu1 %v1029_v7  ;;  %932 = vmatprep.subr.bf16.mxu0 %v1030_v8  ;;  %v1045_v23 = vld [vmem:[#allocation5 + $0xa8] sm:$0xff]   ;;  %v1046_v24 = vld [vmem:[#allocation5 + $0x70] sm:$0xff]   ;;  %v1050_v28 = vld [vmem:[#allocation5 + $0x78] sm:$0xff]  }
  0x30   :  { %954 = vmatprep.subr.bf16.mxu1 %v1031_v9  ;;  %v1047_v25 = vld [vmem:[#allocation5 + $0xf0] sm:$0xff]   ;;  %v1051_v29 = vld [vmem:[#allocation5 + $0xf8] sm:$0xff]   ;;  %v47_v32 = vld [vmem:[#allocation2] sm:$0xff] }
  0x31   :  { %v1048_v26 = vld [vmem:[#allocation5 + $0x30] sm:$0xff]   ;;  %v1052_v30 = vld [vmem:[#allocation5 + $0x38] sm:$0xff]   ;;  %v48_v33 = vld [vmem:[#allocation2 + $0x8] sm:$0xff]  ;;  %v747_v2 = vmul.f32 %v47_v32, %v47_v32 }
  0x32   :  { %933 = vmatpush3.bf16.msra.mxu0 %v1032_v10  ;;  %v1049_v27 = vld [vmem:[#allocation5 + $0xb0] sm:$0xff]   ;;  %v1053_v31 = vld [vmem:[#allocation5 + $0xb8] sm:$0xff]   ;;  %v55_v34 = vld [vmem:[#allocation2 + $0x40] sm:$0xff]  ;;  %v748_v3 = vmul.f32 %v48_v33, %v48_v33 }
  0x33   :  { %955 = vmatpush3.bf16.msra.mxu1 %v1033_v11  ;;  %934 = vmatprep.subr.bf16.mxu0 %v1034_v12  ;;  %v56_v35 = vld [vmem:[#allocation2 + $0x48] sm:$0xff]  ;;  %v1225_v36 = vld [vmem:[#allocation2 + $0x10] sm:$0xff]  ;;  %v1227_v37 = vld [vmem:[#allocation2 + $0x18] sm:$0xff]  ;;  %v63_v38 = vpack.c.bf16 %v55_v34, %v47_v32  ;;  %v755_v60 = vmul.f32 %v55_v34, %v55_v34 }
  0x34   :  { %956 = vmatprep.subr.bf16.mxu1 %v1035_v13  ;;  %v64_v39 = vpack.c.bf16 %v56_v35, %v48_v33  ;;  %v57_v40 = vld [vmem:[#allocation2 + $0x50] sm:$0xff]  ;;  %v58_v41 = vld [vmem:[#allocation2 + $0x58] sm:$0xff]  ;;  %v1054_v43 = vld [vmem:[#allocation5 + $0x140] sm:$0xff]   ;;  %v756_v61 = vmul.f32 %v56_v35, %v56_v35  ;;  %v763_v10 = vadd.f32 %v748_v3, %v747_v2  ;;  %v749_v11 = vmul.f32 %v1225_v36, %v1225_v36 }
  0x35   :  { %v66_v42 = vpack.c.bf16 %v58_v41, %v1227_v37  ;;  %v65_v44 = vpack.c.bf16 %v57_v40, %v1225_v36  ;;  %v1055_v45 = vld [vmem:[#allocation5 + $0x1c0] sm:$0xff]   ;;  %v1058_v48 = vld [vmem:[#allocation5 + $0x148] sm:$0xff]   ;;  %v1062_v52 = vld [vmem:[#allocation5 + $0x150] sm:$0xff]   ;;  %v757_v5 = vmul.f32 %v57_v40, %v57_v40  ;;  %v758_v12 = vmul.f32 %v58_v41, %v58_v41 }
  0x36   :  { %935 = vmatpush3.bf16.msra.mxu0 %v1036_v14  ;;  %615 = vmatprep.mubr.bf16.mxu0 %v64_v39  ;;  %v1056_v46 = vld [vmem:[#allocation5 + $0x100] sm:$0xff]   ;;  %v1059_v49 = vld [vmem:[#allocation5 + $0x1c8] sm:$0xff]   ;;  %v1063_v53 = vld [vmem:[#allocation5 + $0x1d0] sm:$0xff]   ;;  %v772_v4 = vadd.f32 %v756_v61, %v755_v60 }
  0x37   :  { %957 = vmatpush3.bf16.msra.mxu1 %v1037_v15  ;;  %936 = vmatprep.subr.bf16.mxu0 %v1038_v16  ;;  %v1057_v47 = vld [vmem:[#allocation5 + $0x180] sm:$0xff]   ;;  %v1060_v50 = vld [vmem:[#allocation5 + $0x108] sm:$0xff]   ;;  %v1064_v54 = vld [vmem:[#allocation5 + $0x110] sm:$0xff]  }
  0x38   :  { %958 = vmatprep.subr.bf16.mxu1 %v1039_v17  ;;  %656 = vmatprep.mubr.bf16.mxu1 %v66_v42  ;;  %v1061_v51 = vld [vmem:[#allocation5 + $0x188] sm:$0xff]   ;;  %v1065_v55 = vld [vmem:[#allocation5 + $0x190] sm:$0xff]   ;;  %v1066_v56 = vld [vmem:[#allocation5 + $0x158] sm:$0xff]   ;;  %v773_v13 = vadd.f32 %v772_v4, %v757_v5 }
  0x39   :  { %v1067_v57 = vld [vmem:[#allocation5 + $0x1d8] sm:$0xff]   ;;  %v1070_v62 = vld [vmem:[#allocation5 + $0x160] sm:$0xff]   ;;  %v1074_v6 = vld [vmem:[#allocation5 + $0x168] sm:$0xff]  }
  0x3a   :  { %937 = vmatpush3.bf16.msra.mxu0 %v1040_v18  ;;  %v1068_v58 = vld [vmem:[#allocation5 + $0x118] sm:$0xff]   ;;  %v1071_v63 = vld [vmem:[#allocation5 + $0x1e0] sm:$0xff]   ;;  %v1075_v7 = vld [vmem:[#allocation5 + $0x1e8] sm:$0xff]  }
  0x3b   :  { %959 = vmatpush3.bf16.msra.mxu1 %v1041_v19  ;;  %938 = vmatprep.subr.bf16.mxu0 %v1042_v20  ;;  %v1069_v59 = vld [vmem:[#allocation5 + $0x198] sm:$0xff]   ;;  %v1072_v0 = vld [vmem:[#allocation5 + $0x120] sm:$0xff]   ;;  %v1076_v8 = vld [vmem:[#allocation5 + $0x128] sm:$0xff]   ;;  %v750_v19 = vmul.f32 %v1227_v37, %v1227_v37 }
  0x3c   :  { %960 = vmatprep.subr.bf16.mxu1 %v1043_v21  ;;  %v1073_v1 = vld [vmem:[#allocation5 + $0x1a0] sm:$0xff]   ;;  %v1077_v9 = vld [vmem:[#allocation5 + $0x1a8] sm:$0xff]   ;;  %v1078_v14 = vld [vmem:[#allocation5 + $0x170] sm:$0xff]   ;;  %v764_v21 = vadd.f32 %v763_v10, %v749_v11 }
  0x3d   :  { %v59_v15 = vld [vmem:[#allocation2 + $0x60] sm:$0xff]  ;;  %v1079_v16 = vld [vmem:[#allocation5 + $0x1f0] sm:$0xff]   ;;  %v62_v34 = vld [vmem:[#allocation2 + $0x78] sm:$0xff] }
  0x3e   :  { %939 = vmatpush3.bf16.msra.mxu0 %v1044_v22  ;;  %v1080_v17 = vld [vmem:[#allocation5 + $0x130] sm:$0xff]   ;;  %v759_v20 = vmul.f32 %v59_v15, %v59_v15  ;;  %v774_v22 = vadd.f32 %v773_v13, %v758_v12  ;;  %v51_v35 = vld [vmem:[#allocation2 + $0x20] sm:$0xff] }
  0x3f   :  { %961 = vmatpush3.bf16.msra.mxu1 %v1045_v23  ;;  %940 = vmatprep.subr.bf16.mxu0 %v1046_v24  ;;  %v1081_v18 = vld [vmem:[#allocation5 + $0x1b0] sm:$0xff]   ;;  %v1082_v23 = vld [vmem:[#allocation5 + $0x178] sm:$0xff]   ;;  %v751_v40 = vmul.f32 %v51_v35, %v51_v35 }
  0x40   :  { %962 = vmatprep.subr.bf16.mxu1 %v1047_v25  ;;  %v1083_v24 = vld [vmem:[#allocation5 + $0x1f8] sm:$0xff]   ;;  %v53_v36 = vld [vmem:[#allocation2 + $0x30] sm:$0xff] }
  0x41   :  { %v1084_v25 = vld [vmem:[#allocation5 + $0x138] sm:$0xff]   ;;  %v61_v39 = vld [vmem:[#allocation2 + $0x70] sm:$0xff] }
  0x42   :  { %941 = vmatpush3.bf16.msra.mxu0 %v1048_v26  ;;  %v1085_v26 = vld [vmem:[#allocation5 + $0x1b8] sm:$0xff]   ;;  %v69_v42 = vpack.c.bf16 %v61_v39, %v53_v36 }
  0x43   :  { %963 = vmatpush3.bf16.msra.mxu1 %v1049_v27  ;;  %942 = vmatprep.subr.bf16.mxu0 %v1050_v28  ;;  %v765_v27 = vadd.f32 %v764_v21, %v750_v19  ;;  %v775_v28 = vadd.f32 %v774_v22, %v759_v20  ;;  %v917_v21 = vld [vmem:[%s1259_s3] ss:$0 sm:$0xff] }
  0x44   :  { %964 = vmatprep.subr.bf16.mxu1 %v1051_v29  ;;  %v52_v29 = vld [vmem:[#allocation2 + $0x28] sm:$0xff] }
  0x45   :  { %v752_v41 = vmul.f32 %v52_v29, %v52_v29 }
  0x46   :  { %943 = vmatpush3.bf16.msra.mxu0 %v1052_v30  ;;  %v60_v30 = vld [vmem:[#allocation2 + $0x68] sm:$0xff] }
  0x47   :  { %965 = vmatpush3.bf16.msra.mxu1 %v1053_v31  ;;  %972 = vmatprep.subr.bf16.mxu0 %v1054_v43  ;;  %v54_v31 = vld [vmem:[#allocation2 + $0x38] sm:$0xff]  ;;  %v68_v32 = vpack.c.bf16 %v60_v30, %v52_v29  ;;  %v760_v33 = vmul.f32 %v60_v30, %v60_v30  ;;  %v753_v43 = vmul.f32 %v53_v36, %v53_v36 }
  0x48   :  { %994 = vmatprep.subr.bf16.mxu1 %v1055_v45  ;;  %v70_v37 = vpack.c.bf16 %v62_v34, %v54_v31  ;;  %v761_v45 = vmul.f32 %v61_v39, %v61_v39 }
  0x49   :  { %616 = vmatmul.mubr.bf16.vlgmr.msra.gmra.mrb[0].mxu0 %v63_v38  ;;  %v67_v38 = vpack.c.bf16 %v59_v15, %v51_v35 }
  0x4a   :  { %657 = vmatmul.mubr.bf16.vlgmr.msra.gmra.mrb[0].mxu1 %v65_v44  ;;  %973 = vmatpush3.bf16.msra.mxu0 %v1056_v46  ;;  %v766_v44 = vadd.f32 %v765_v27, %v751_v40  ;;  %v776_v46 = vadd.f32 %v775_v28, %v760_v33 }
  0x4b   :  { %995 = vmatpush3.bf16.msra.mxu1 %v1057_v47  ;;  %974 = vmatprep.subr.bf16.mxu0 %v1058_v48  ;;  %v754_v47 = vmul.f32 %v54_v31, %v54_v31 }
  0x4c   :  { %996 = vmatprep.subr.bf16.mxu1 %v1059_v49  ;;  %697 = vmatprep.mubr.bf16.mxu0 %v68_v32  ;;  %v767_v48 = vadd.f32 %v766_v44, %v752_v41  ;;  %v918_v44 = vld [vmem:[%s1258_s2] ss:$0 sm:$0xff] }
  0x4d   :  { %738 = vmatprep.mubr.bf16.mxu1 %v70_v37 }
  0x4e   :  { %975 = vmatpush3.bf16.msra.mxu0 %v1060_v50  ;;  %v768_v49 = vadd.f32 %v767_v48, %v753_v43  ;;  %v762_v50 = vmul.f32 %v62_v34, %v62_v34 }
  0x4f   :  { %997 = vmatpush3.bf16.msra.mxu1 %v1061_v51  ;;  %976 = vmatprep.subr.bf16.mxu0 %v1062_v52  ;;  %v777_v51 = vadd.f32 %v776_v46, %v761_v45 }
  0x50   :  { %998 = vmatprep.subr.bf16.mxu1 %v1063_v53  ;;  %v769_v52 = vadd.f32 %v768_v49, %v754_v47 }
  0x51   :  { %v778_v53 = vadd.f32 %v777_v51, %v762_v50 }
  0x52   :  { %977 = vmatpush3.bf16.msra.mxu0 %v1064_v54  ;;  %770 = vadd.xlane.f32.xlu0 %v769_v52 }
  0x53   :  { %999 = vmatpush3.bf16.msra.mxu1 %v1065_v55  ;;  %978 = vmatprep.subr.bf16.mxu0 %v1066_v56 }
  0x54   :  { %1000 = vmatprep.subr.bf16.mxu1 %v1067_v57 }
  0x56   :  { %979 = vmatpush3.bf16.msra.mxu0 %v1068_v58  ;;  %779 = vadd.xlane.f32.xlu0 %v778_v53 }
  0x57   :  { %1001 = vmatpush3.bf16.msra.mxu1 %v1069_v59  ;;  %980 = vmatprep.subr.bf16.mxu0 %v1070_v62 }
  0x58   :  { %1002 = vmatprep.subr.bf16.mxu1 %v1071_v63 }
  0x5a   :  { %981 = vmatpush3.bf16.msra.mxu0 %v1072_v0 }
  0x5b   :  { %1003 = vmatpush3.bf16.msra.mxu1 %v1073_v1  ;;  %982 = vmatprep.subr.bf16.mxu0 %v1074_v6 }
  0x5c   :  { %1004 = vmatprep.subr.bf16.mxu1 %v1075_v7 }
  0x5e   :  { %983 = vmatpush3.bf16.msra.mxu0 %v1076_v8 }
  0x5f   :  { %1005 = vmatpush3.bf16.msra.mxu1 %v1077_v9  ;;  %984 = vmatprep.subr.bf16.mxu0 %v1078_v14 }
  0x60   :  { %1006 = vmatprep.subr.bf16.mxu1 %v1079_v16 }
  0x62   :  { %985 = vmatpush3.bf16.msra.mxu0 %v1080_v17 }
  0x63   :  { %1007 = vmatpush3.bf16.msra.mxu1 %v1081_v18  ;;  %986 = vmatprep.subr.bf16.mxu0 %v1082_v23 }
  0x64   :  { %1008 = vmatprep.subr.bf16.mxu1 %v1083_v24 }
  0x66   :  { %987 = vmatpush3.bf16.msra.mxu0 %v1084_v25 }
  0x67   :  { %1009 = vmatpush3.bf16.msra.mxu1 %v1085_v26 }
  0x69   :  { %698 = vmatmul.mubr.bf16.vlgmr.msra.gmra.mrb[4].mxu0 %v67_v38 }
  0x6a   :  { %739 = vmatmul.mubr.bf16.vlgmr.msra.gmra.mrb[4].mxu1 %v69_v42 }
  0xdf   :  { %v771_v54 = vpop.xlane.xlu0 %770 }
  0xe0   :  { %1086 = vrsqrt.f32 %v771_v54  ;;  %vm783_vm0 = vcmp.eq.f32.partialorder %v771_v54, inf  ;;  %v786_v10 = vand.u32 2147483648, %v771_v54  ;;  %vm785_vm2 = vcmp.eq.f32.partialorder %v771_v54, 0.0 }
  0xe3   :  { %v780_v55 = vpop.xlane.xlu0 %779 }
  0xe4   :  { %1088 = vrsqrt.f32 %v780_v55  ;;  %vm790_vm1 = vcmp.eq.f32.partialorder %v780_v55, inf  ;;  %v793_v12 = vand.u32 2147483648, %v780_v55  ;;  %vm792_vm3 = vcmp.eq.f32.partialorder %v780_v55, 0.0 }
  0xea   :  { %v1087_v59 = vpop.eup %1086 }
  0xeb   :  { %v782_v5 = vmul.f32 %v1087_v59, %v771_v54 }
  0xed   :  { %v784_v11 = vsel %vm783_vm0, %v771_v54, %v782_v5 }
  0xee   :  { %v1089_v2 = vpop.eup %1088  ;;  %v787_v14 = vsel %vm785_vm2, %v786_v10, %v784_v11 }
  0xef   :  { %v789_v8 = vmul.f32 %v1089_v2, %v780_v55  ;;  %v795_v16 = vadd.f32 1e-05, %v787_v14 }
  0xf1   :  { %v791_v13 = vsel %vm790_vm1, %v780_v55, %v789_v8  ;;  %1090 = vrcp.f32 %v795_v16 }
  0xf2   :  { %v794_v15 = vsel %vm792_vm3, %v793_v12, %v791_v13 }
  0xf3   :  { %v796_v17 = vadd.f32 1e-05, %v794_v15 }
  0xf5   :  { %1092 = vrcp.f32 %v796_v17 }
  0xfb   :  { %v1091_v18 = vpop.eup %1090 }
  0xfc   :  { %v915_v20 = vadd.f32 -1.0, %v1091_v18 }
  0xfe   :  { %v808_v28 = vmul.f32 %v917_v21, %v915_v20 }
  0xff   :  { %v1093_v19 = vpop.eup %1092 }
 0x100   :  { %v916_v23 = vadd.f32 -1.0, %v1093_v19  ;;  %v810_v39 = vadd.f32 1.0, %v808_v28 }
 0x102   :  { %v809_v36 = vmul.f32 %v917_v21, %v916_v23 }
 0x104   :  { %v811_v43 = vadd.f32 1.0, %v809_v36 }
 0x11c   :  { %v944_v56 = vpop.f32.mrb[0].mxu0 }
 0x11d   :  { %v966_v57 = vpop.f32.mrb[0].mxu1  ;;  %v945_v58 = vpop.f32.mrb[1].mxu0 }
 0x11e   :  { %v946_v60 = vadd.f32 %v945_v58, %v944_v56  ;;  %v967_v61 = vpop.f32.mrb[1].mxu1  ;;  %v947_v62 = vpop.f32.mrb[2].mxu0 }
 0x11f   :  { %v968_v63 = vadd.f32 %v967_v61, %v966_v57  ;;  %v969_v0 = vpop.f32.mrb[2].mxu1  ;;  %v948_v1 = vpop.f32.mrb[3].mxu0 }
 0x120   :  { %v949_v3 = vadd.f32 %v948_v1, %v947_v62  ;;  %v970_v4 = vpop.f32.mrb[3].mxu1 }
 0x121   :  { %v659_v6 = vadd.f32 %v968_v63, %v946_v60  ;;  %v971_v7 = vadd.f32 %v970_v4, %v969_v0 }
 0x123   :  { %v662_v9 = vadd.f32 %v971_v7, %v949_v3 }
 0x13c   :  { %v988_v22 = vpop.f32.mrb[4].mxu0 }
 0x13d   :  { %v1010_v24 = vpop.f32.mrb[4].mxu1  ;;  %v989_v25 = vpop.f32.mrb[5].mxu0 }
 0x13e   :  { %v990_v26 = vadd.f32 %v989_v25, %v988_v22  ;;  %v1011_v27 = vpop.f32.mrb[5].mxu1  ;;  %v991_v29 = vpop.f32.mrb[6].mxu0 }
 0x13f   :  { %v1012_v30 = vadd.f32 %v1011_v27, %v1010_v24  ;;  %v1013_v31 = vpop.f32.mrb[6].mxu1  ;;  %v992_v32 = vpop.f32.mrb[7].mxu0 }
 0x140   :  { %v700_v33 = vadd.f32 %v990_v26, %v659_v6  ;;  %v993_v34 = vadd.f32 %v992_v32, %v991_v29  ;;  %v1014_v35 = vpop.f32.mrb[7].mxu1 }
 0x141   :  { %v1015_v37 = vadd.f32 %v1014_v35, %v1013_v31 }
 0x142   :  { %v741_v38 = vadd.f32 %v1012_v30, %v700_v33  ;;  %v703_v40 = vadd.f32 %v993_v34, %v662_v9 }
 0x144   :  { %v812_v41 = vmul.f32 %v810_v39, %v741_v38  ;;  %v744_v42 = vadd.f32 %v1015_v37, %v703_v40 }
 0x146   :  { %v813_v45 = vmul.f32 %v811_v43, %v744_v42  ;;  %v821_v46 = vadd.f32 %v918_v44, %v812_v41 }
 0x148   :  { %v822_v47 = vadd.f32 %v918_v44, %v813_v45 }
 0x14a   :  { %v926_v48 = vpack.c.bf16 %v822_v47, %v821_v46 }
 0x14c   :  { %927 = vst [vmem:[#allocation7] sm:$0xff] %v926_v48  }
 0x14d   :  { %1149 = shalt.err (!%p1146_p6)
}
 0x14e   :  { %s1150_s22 = scalar_lea.hbm %s1260_s4, 128 }
 0x14f   :  { %p1151_p7 = scmp.ne.s32.totalorder %s1260_s4, %s1150_s22  ;;  %p1154_p8 = scmp.lt.u32.totalorder %s1150_s22, %s1260_s4 }
 0x151   :  { %p1156_p9 = pnand %p1154_p8, %p1151_p7 }
 0x153   :  { %1159 = shalt.err (!%p1156_p9)
}
 0x154   :  { %844 = dma.vmem_to_hbm [thread:$0]  %s839_s18, 128, %s1260_s4, [#allocation4], %s1168_s26, %s1168_s26, %s1170_s0  }
 0x155   :  { %1164 = dma.done.wait [#allocation4], 128  }
 0x156   :  { %1165 = vsyncadd [#allocation4], 4294967168 }
 0x157   :  { %848 = vsyncpa [#allocation3], 1 }
 0x158   :  { %849 = vsyncpa [#allocation6], 1 }
 0x159   :  { %850 = vsyncpa [#allocation4], 1 }

</bundles_post_ra>
